<compile_context>
chip_gen: v6e
topology: v6e:2x2x1
jax: 0.10.0
libtpu: 0.0.40
codegen_flags: <defaults>
</compile_context>

<pallas_src>
import functools

import numpy as np

import jax
import jax.numpy as jnp
from jax import lax
from jax.experimental import pallas as pl
from jax.experimental.pallas import tpu as pltpu

EPS = 1e-5          # nn.InstanceNorm2d default eps
LPAD = 128          # lane-aligned halo pad on each side of the flat spatial axis


# ---------------------------------------------------------------------------
# In-kernel helpers (traced inline; all shapes static)
# ---------------------------------------------------------------------------
def _conv3x3_im2col(pad_ref, w_ref, mask_l, mask_r, W, HW):
    """3x3 'same' conv as ONE im2col matmul.

    pad_ref: (Cin, LPAD + HW + LPAD) bf16 flat zero-haloed activation.
             Interior (the H*W image, row-major) lives at lanes
             [LPAD, LPAD+HW); the borders are zero so row over/underflow of a
             tap automatically reads zeros.
    w_ref:   (Cout, 9*Cin) bf16, column index = tap*Cin + ci with
             tap = (dy+1)*3 + (dx+1).
    mask_l/mask_r: (1, HW) bf16 {0,1}; zero where x-1 / x+1 falls outside the
             image (column wrap of the flat layout).
    Returns an f32 (Cout, HW) accumulator.
    """
    pieces = []
    for dy in (-1, 0, 1):
        for dx in (-1, 0, 1):
            d = dy * W + dx
            tap = pad_ref[:, LPAD + d:LPAD + d + HW]        # (Cin, HW) bf16
            if dx == -1:
                tap = tap * mask_l
            elif dx == 1:
                tap = tap * mask_r
            pieces.append(tap)
    patches = jnp.concatenate(pieces, axis=0)               # (9*Cin, HW) bf16
    return lax.dot_general(                                  # one MXU matmul
        w_ref[...], patches,
        dimension_numbers=(((1,), (0,)), ((), ())),
        preferred_element_type=jnp.float32)                  # (Cout, HW) f32


def _instance_norm_relu(acc, gamma, beta):
    """Per-channel instance norm over the lane (spatial) axis + affine + ReLU.

    Two-pass statistics in f32 (mean, then centered variance) per the review's
    correctness note; matches PyTorch biased variance + eps semantics.
    """
    mean = jnp.mean(acc, axis=1, keepdims=True)              # (C, 1)
    cent = acc - mean
    var = jnp.mean(cent * cent, axis=1, keepdims=True)
    y = cent * lax.rsqrt(var + EPS)
    return jnp.maximum(y * gamma + beta, 0.0)


# ---------------------------------------------------------------------------
# Fused kernel: upsample(x1) + pad + concat + (conv3x3 -> IN -> ReLU) * 2
# One grid step == one batch instance (instance-norm stats are per instance).
# ---------------------------------------------------------------------------
def _up_double_conv_kernel(W,                                # static image width
                           x2_ref, x1_ref, u_ref, mask_ref,
                           w1_ref, g1_ref, b1_ref, w2_ref, g2_ref, b2_ref,
                           o_ref, pad1, pad2):
    # x2_ref: (1, C2, HW) bf16      x1_ref: (1, C1, h*w) bf16 (low-res)
    # u_ref:  (h*w, HW) f32 combined upsample+pad matrix
    # mask_ref: (2, HW) bf16 column-validity masks
    # w1_ref: (Cout, 9*(C2+C1)) bf16   w2_ref: (Cout, 9*Cout) bf16
    # g*/b*:  (Cout, 1) f32            o_ref: (1, Cout, HW) f32
    # pad1/pad2: flat zero-haloed bf16 VMEM scratch
    C2 = x2_ref.shape[1]
    C1 = x1_ref.shape[1]
    Cin = C1 + C2
    Cout = o_ref.shape[1]
    HW = o_ref.shape[2]
    PW = pad1.shape[1]

    mask_l = mask_ref[0:1, :]
    mask_r = mask_ref[1:2, :]

    # --- bilinear x2 upsample + F.pad of x1, folded into one small matmul ---
    x1_up = lax.dot_general(
        x1_ref[0].astype(jnp.float32), u_ref[...],
        dimension_numbers=(((1,), (0,)), ((), ())),
        preferred_element_type=jnp.float32)                  # (C1, HW) f32

    # --- stage conv1 input (channel concat folded in) into flat halo scratch.
    # Only the lane-aligned border strips are zeroed; the interior store is
    # 128-lane aligned.  Re-done every grid step so the "parallel" (megacore)
    # split stays correct.
    pad1[:, 0:LPAD] = jnp.zeros((Cin, LPAD), pad1.dtype)
    pad1[:, LPAD + HW:PW] = jnp.zeros((Cin, PW - LPAD - HW), pad1.dtype)
    pad1[0:C2, LPAD:LPAD + HW] = x2_ref[0]
    pad1[C2:Cin, LPAD:LPAD + HW] = x1_up.astype(pad1.dtype)

    acc1 = _conv3x3_im2col(pad1, w1_ref, mask_l, mask_r, W, HW)
    y1 = _instance_norm_relu(acc1, g1_ref[...], b1_ref[...])

    # --- layer-1 activation never leaves VMEM ---
    pad2[:, 0:LPAD] = jnp.zeros((Cout, LPAD), pad2.dtype)
    pad2[:, LPAD + HW:PW] = jnp.zeros((Cout, PW - LPAD - HW), pad2.dtype)
    pad2[:, LPAD:LPAD + HW] = y1.astype(pad2.dtype)

    acc2 = _conv3x3_im2col(pad2, w2_ref, mask_l, mask_r, W, HW)
    y2 = _instance_norm_relu(acc2, g2_ref[...], b2_ref[...])
    o_ref[0] = y2.astype(o_ref.dtype)                        # lane-dense store


def up_double_conv(x2_flat, x1_flat, u, mask, w1m, g1, b1, w2m, g2, b2, *, W):
    """x2_flat: (N, C2, H*W) bf16; x1_flat: (N, C1, h*w) bf16 (low-res)."""
    N, C2, HW = x2_flat.shape
    C1, hw = x1_flat.shape[1], x1_flat.shape[2]
    Cin = C1 + C2
    Cout = w1m.shape[0]
    PW = LPAD + HW + LPAD

    kernel = functools.partial(_up_double_conv_kernel, W)
    return pl.pallas_call(
        kernel,
        out_shape=jax.ShapeDtypeStruct((N, Cout, HW), jnp.float32),
        grid=(N,),
        in_specs=[
            pl.BlockSpec((1, C2, HW), lambda n: (n, 0, 0)),
            pl.BlockSpec((1, C1, hw), lambda n: (n, 0, 0)),
            pl.BlockSpec((hw, HW), lambda n: (0, 0)),
            pl.BlockSpec((2, HW), lambda n: (0, 0)),
            pl.BlockSpec((Cout, 9 * Cin), lambda n: (0, 0)),
            pl.BlockSpec((Cout, 1), lambda n: (0, 0)),
            pl.BlockSpec((Cout, 1), lambda n: (0, 0)),
            pl.BlockSpec((Cout, 9 * Cout), lambda n: (0, 0)),
            pl.BlockSpec((Cout, 1), lambda n: (0, 0)),
            pl.BlockSpec((Cout, 1), lambda n: (0, 0)),
        ],
        out_specs=pl.BlockSpec((1, Cout, HW), lambda n: (n, 0, 0)),
        scratch_shapes=[
            pltpu.VMEM((Cin, PW), jnp.bfloat16),   # conv1 flat haloed input
            pltpu.VMEM((Cout, PW), jnp.bfloat16),  # conv2 flat haloed input
        ],
        compiler_params=pltpu.CompilerParams(
            dimension_semantics=("parallel",),
            vmem_limit_bytes=32 * 1024 * 1024),
    )(x2_flat, x1_flat, u, mask, w1m, g1, b1, w2m, g2, b2)


# ---------------------------------------------------------------------------
# Host-side constants (built with numpy at trace time -> compile constants)
# ---------------------------------------------------------------------------
def _np_bilinear_matrix(n_in, n_out):
    """1-D bilinear interpolation matrix, align_corners=True (torch semantics)."""
    if n_in == 1:
        return np.ones((n_out, 1), np.float32)
    src = np.arange(n_out, dtype=np.float64) * (n_in - 1) / (n_out - 1)
    i0 = np.clip(np.floor(src).astype(np.int64), 0, n_in - 2)
    frac = (src - i0).astype(np.float32)
    M = np.zeros((n_out, n_in), np.float32)
    rows = np.arange(n_out)
    M[rows, i0] += 1.0 - frac
    M[rows, i0 + 1] += frac
    return M


def _upsample_pad_matrix(h, w, H, W):
    """(h*w, H*W) matrix combining x2 bilinear upsample (align_corners) + F.pad."""
    Mh = _np_bilinear_matrix(h, 2 * h)                      # (2h, h)
    Mw = _np_bilinear_matrix(w, 2 * w)                      # (2w, w)
    dY, dX = H - 2 * h, W - 2 * w
    Mh_p = np.zeros((H, h), np.float32)
    Mh_p[dY // 2:dY // 2 + 2 * h, :] = Mh
    Mw_p = np.zeros((W, w), np.float32)
    Mw_p[dX // 2:dX // 2 + 2 * w, :] = Mw
    # U[i*w+j, y*W+x] = Mh_p[y, i] * Mw_p[x, j]
    U = np.einsum("yi,xj->ijyx", Mh_p, Mw_p).reshape(h * w, H * W)
    return jnp.asarray(U)


def _col_masks(H, W):
    """(2, H*W) bf16 {0,1} masks: row0 -> x-1 in range, row1 -> x+1 in range."""
    x_idx = np.arange(H * W) % W
    m_l = (x_idx >= 1).astype(np.float32)
    m_r = (x_idx <= W - 2).astype(np.float32)
    return jnp.asarray(np.stack([m_l, m_r]), dtype=jnp.bfloat16)


# ---------------------------------------------------------------------------
# Parameter construction (deterministic, synthetic; conv weights kept in bf16
# since the MXU operands are bf16 — f32 accumulation/IN as in mixed precision)
# ---------------------------------------------------------------------------
def init_up_params(key, in_ch, out_ch):
    k1, k2, k3, k4, k5, k6 = jax.random.split(key, 6)
    s1 = float(1.0 / np.sqrt(9.0 * in_ch))
    s2 = float(1.0 / np.sqrt(9.0 * out_ch))
    return {
        # conv weights stored HWIO: (3, 3, Cin, Cout)
        "w1": jax.random.uniform(k1, (3, 3, in_ch, out_ch), jnp.float32,
                                 -s1, s1).astype(jnp.bfloat16),
        "g1": 1.0 + 0.1 * jax.random.normal(k2, (out_ch, 1), jnp.float32),
        "b1": 0.1 * jax.random.normal(k3, (out_ch, 1), jnp.float32),
        "w2": jax.random.uniform(k4, (3, 3, out_ch, out_ch), jnp.float32,
                                 -s2, s2).astype(jnp.bfloat16),
        "g2": 1.0 + 0.1 * jax.random.normal(k5, (out_ch, 1), jnp.float32),
        "b2": 0.1 * jax.random.normal(k6, (out_ch, 1), jnp.float32),
    }


# ---------------------------------------------------------------------------
# Full `up.forward` (NCHW in / NCHW out, like the PyTorch module)
# ---------------------------------------------------------------------------
@jax.jit
def up_forward(params, x1_nchw, x2_nchw):
    N, C1, h, w = x1_nchw.shape
    _, C2, H, W = x2_nchw.shape
    Cin = C1 + C2
    Cout = params["w1"].shape[-1]

    # Channel-major, lane-dense layout: NCHW -> (N, C, H*W) is a free reshape.
    x1 = x1_nchw.reshape(N, C1, h * w).astype(jnp.bfloat16)
    x2 = x2_nchw.reshape(N, C2, H * W).astype(jnp.bfloat16)

    u = _upsample_pad_matrix(h, w, H, W)       # trace-time constant
    mask = _col_masks(H, W)                    # trace-time constant

    # (3,3,Cin,Cout) HWIO -> (Cout, 9*Cin), column = tap*Cin + ci
    w1m = jnp.transpose(params["w1"].reshape(9, Cin, Cout), (2, 0, 1)
                        ).reshape(Cout, 9 * Cin)
    w2m = jnp.transpose(params["w2"].reshape(9, Cout, Cout), (2, 0, 1)
                        ).reshape(Cout, 9 * Cout)

    y = up_double_conv(x2, x1, u, mask, w1m, params["g1"], params["b1"],
                       w2m, params["g2"], params["b2"], W=W)
    return y.reshape(N, Cout, H, W)            # free reshape, no transpose


# ---------------------------------------------------------------------------
# Pure-JAX reference (no Pallas) for correctness.  It follows the same
# mixed-precision contract (bf16-quantized inputs/weights, f32 math) so the
# comparison isolates kernel logic from bf16 quantization of the inputs.
# ---------------------------------------------------------------------------
def _ref_conv_in_relu(x_nchw, w_hwio, gamma, beta):
    Cout = w_hwio.shape[-1]
    y = lax.conv_general_dilated(
        x_nchw, w_hwio.astype(jnp.float32), (1, 1), ((1, 1), (1, 1)),
        dimension_numbers=("NCHW", "HWIO", "NCHW"),
        preferred_element_type=jnp.float32)
    mean = jnp.mean(y, axis=(2, 3), keepdims=True)
    var = jnp.mean((y - mean) ** 2, axis=(2, 3), keepdims=True)
    yn = (y - mean) * lax.rsqrt(var + EPS)
    yn = yn * gamma.reshape(1, Cout, 1, 1) + beta.reshape(1, Cout, 1, 1)
    return jnp.maximum(yn, 0.0)


def _ref_up_forward(params, x1_nchw, x2_nchw):
    x1 = x1_nchw.astype(jnp.bfloat16).astype(jnp.float32)
    x2 = x2_nchw.astype(jnp.bfloat16).astype(jnp.float32)
    N, C1, h, w = x1.shape
    H, W = x2.shape[2], x2.shape[3]
    Mh = jnp.asarray(_np_bilinear_matrix(h, 2 * h))
    Mw = jnp.asarray(_np_bilinear_matrix(w, 2 * w))
    x1u = jnp.einsum("oh,nchw->ncow", Mh, x1)
    x1u = jnp.einsum("pw,ncow->ncop", Mw, x1u)
    dY, dX = H - 2 * h, W - 2 * w
    x1u = jnp.pad(x1u, ((0, 0), (0, 0),
                        (dY // 2, dY - dY // 2), (dX // 2, dX - dX // 2)))
    x = jnp.concatenate([x2, x1u], axis=1)
    x = _ref_conv_in_relu(x, params["w1"], params["g1"], params["b1"])
    x = _ref_conv_in_relu(x, params["w2"], params["g2"], params["b2"])
    return x


if __name__ == "__main__":
    # up(in_ch=8, out_ch=8): x1 has 4 channels at 8x8 (upsampled -> 16x16),
    # x2 has 4 channels at 16x16; output is (N, 8, 16, 16).
    in_ch, out_ch = 8, 8
    N = 2
    key = jax.random.PRNGKey(0)
    kx1, kx2, kp = jax.random.split(key, 3)

    x1 = jax.random.normal(kx1, (N, in_ch // 2, 8, 8), jnp.float32)     # NCHW
    x2 = jax.random.normal(kx2, (N, in_ch // 2, 16, 16), jnp.float32)   # NCHW
    params = init_up_params(kp, in_ch, out_ch)

    out = jax.block_until_ready(up_forward(params, x1, x2))
    assert out.shape == (N, out_ch, 16, 16), out.shape

    ref = jax.block_until_ready(jax.jit(_ref_up_forward)(params, x1, x2))
    max_err = float(jnp.max(jnp.abs(out - ref)))
    # bf16 MXU operands (in-kernel casts of the upsampled x1 and the mid
    # activation) vs. the f32 reference: expected divergence is ~1e-2.
    assert max_err < 5e-2, f"max_err={max_err}"

    print("KERNEL_OK")
</pallas_src>

<mosaic_0001>
module attributes {stable_mosaic.version = 11 : i64} {
  func.func @_up_double_conv_kernel(%arg0: i32, %arg1: memref<1x4x256xbf16, #tpu.memory_space<vmem>>, %arg2: memref<1x4x64xbf16, #tpu.memory_space<vmem>>, %arg3: memref<64x256xf32, #tpu.memory_space<vmem>>, %arg4: memref<2x256xbf16, #tpu.memory_space<vmem>>, %arg5: memref<8x72xbf16, #tpu.memory_space<vmem>>, %arg6: memref<8x1xf32, #tpu.memory_space<vmem>>, %arg7: memref<8x1xf32, #tpu.memory_space<vmem>>, %arg8: memref<8x72xbf16, #tpu.memory_space<vmem>>, %arg9: memref<8x1xf32, #tpu.memory_space<vmem>>, %arg10: memref<8x1xf32, #tpu.memory_space<vmem>>, %arg11: memref<1x8x256xf32, #tpu.memory_space<vmem>>, %arg12: memref<8x512xbf16, #tpu.memory_space<vmem>>, %arg13: memref<8x512xbf16, #tpu.memory_space<vmem>>) attributes {dimension_semantics = [#tpu.dimension_semantics<parallel>], iteration_bounds = array<i64: 2>, scalar_prefetch = 0 : i64, scratch_operands = 2 : i64, tpu.core_type = #tpu.core_type<tc>, window_params = [{transform_indices = @transform_0, window_bounds = array<i64: 1, 4, 256>}, {transform_indices = @transform_1, window_bounds = array<i64: 1, 4, 64>}, {pipeline_mode = #tpu.pipeline_mode<synchronous>, transform_indices = @transform_2, window_bounds = array<i64: 64, 256>}, {pipeline_mode = #tpu.pipeline_mode<synchronous>, transform_indices = @transform_3, window_bounds = array<i64: 2, 256>}, {pipeline_mode = #tpu.pipeline_mode<synchronous>, transform_indices = @transform_4, window_bounds = array<i64: 8, 72>}, {pipeline_mode = #tpu.pipeline_mode<synchronous>, transform_indices = @transform_5, window_bounds = array<i64: 8, 1>}, {pipeline_mode = #tpu.pipeline_mode<synchronous>, transform_indices = @transform_6, window_bounds = array<i64: 8, 1>}, {pipeline_mode = #tpu.pipeline_mode<synchronous>, transform_indices = @transform_7, window_bounds = array<i64: 8, 72>}, {pipeline_mode = #tpu.pipeline_mode<synchronous>, transform_indices = @transform_8, window_bounds = array<i64: 8, 1>}, {pipeline_mode = #tpu.pipeline_mode<synchronous>, transform_indices = @transform_9, window_bounds = array<i64: 8, 1>}, {transform_indices = @transform_10, window_bounds = array<i64: 1, 8, 256>}]} {
    %c0 = arith.constant 0 : index
    %c0_0 = arith.constant 0 : index
    %0 = vector.load %arg4[%c0, %c0_0] : memref<2x256xbf16, #tpu.memory_space<vmem>>, vector<1x256xbf16>
    %c1 = arith.constant 1 : index
    %c0_1 = arith.constant 0 : index
    %1 = vector.load %arg4[%c1, %c0_1] : memref<2x256xbf16, #tpu.memory_space<vmem>>, vector<1x256xbf16>
    %c0_2 = arith.constant 0 : index
    %c0_3 = arith.constant 0 : index
    %c0_4 = arith.constant 0 : index
    %2 = vector.load %arg2[%c0_2, %c0_3, %c0_4] : memref<1x4x64xbf16, #tpu.memory_space<vmem>>, vector<1x4x64xbf16>
    %3 = vector.shape_cast %2 : vector<1x4x64xbf16> to vector<4x64xbf16>
    %4 = arith.extf %3 : vector<4x64xbf16> to vector<4x64xf32>
    %c0_5 = arith.constant 0 : index
    %c0_6 = arith.constant 0 : index
    %5 = vector.load %arg3[%c0_5, %c0_6] : memref<64x256xf32, #tpu.memory_space<vmem>>, vector<64x256xf32>
    %cst = arith.constant dense<0.000000e+00> : vector<4x256xf32>
    %6 = tpu.matmul %4, %5, %cst {dimension_numbers = #tpu.dot_dimension_numbers<[1], [0], [0], [1], [0, 0, 1, 1], [], []>} : vector<4x64xf32>, vector<64x256xf32>, vector<4x256xf32> -> vector<4x256xf32>
    %cst_7 = arith.constant 0.000000e+00 : bf16
    %7 = vector.broadcast %cst_7 : bf16 to vector<8x128xbf16>
    %c0_8 = arith.constant 0 : index
    %c0_9 = arith.constant 0 : index
    %8 = vector.load %arg12[%c0_8, %c0_9] : memref<8x512xbf16, #tpu.memory_space<vmem>>, vector<8x128xbf16>
    tpu.vector_store %arg12[%c0_8, %c0_9], %7 {strides = array<i32>} : memref<8x512xbf16, #tpu.memory_space<vmem>>, vector<8x128xbf16>,
    %cst_10 = arith.constant 0.000000e+00 : bf16
    %9 = vector.broadcast %cst_10 : bf16 to vector<8x128xbf16>
    %c0_11 = arith.constant 0 : index
    %c384 = arith.constant 384 : index
    %10 = vector.load %arg12[%c0_11, %c384] : memref<8x512xbf16, #tpu.memory_space<vmem>>, vector<8x128xbf16>
    tpu.vector_store %arg12[%c0_11, %c384], %9 {strides = array<i32>} : memref<8x512xbf16, #tpu.memory_space<vmem>>, vector<8x128xbf16>,
    %c0_12 = arith.constant 0 : index
    %c0_13 = arith.constant 0 : index
    %c0_14 = arith.constant 0 : index
    %11 = vector.load %arg1[%c0_12, %c0_13, %c0_14] : memref<1x4x256xbf16, #tpu.memory_space<vmem>>, vector<1x4x256xbf16>
    %12 = vector.shape_cast %11 : vector<1x4x256xbf16> to vector<4x256xbf16>
    %c0_15 = arith.constant 0 : index
    %c128 = arith.constant 128 : index
    %13 = vector.load %arg12[%c0_15, %c128] : memref<8x512xbf16, #tpu.memory_space<vmem>>, vector<4x256xbf16>
    tpu.vector_store %arg12[%c0_15, %c128], %12 {strides = array<i32>} : memref<8x512xbf16, #tpu.memory_space<vmem>>, vector<4x256xbf16>,
    %14 = arith.truncf %6 : vector<4x256xf32> to vector<4x256xbf16>
    %c4 = arith.constant 4 : index
    %c128_16 = arith.constant 128 : index
    %15 = vector.load %arg12[%c4, %c128_16] : memref<8x512xbf16, #tpu.memory_space<vmem>>, vector<4x256xbf16>
    tpu.vector_store %arg12[%c4, %c128_16], %14 {strides = array<i32>} : memref<8x512xbf16, #tpu.memory_space<vmem>>, vector<4x256xbf16>,
    %c0_17 = arith.constant 0 : index
    %c111 = arith.constant 111 : index
    %16 = vector.load %arg12[%c0_17, %c111] : memref<8x512xbf16, #tpu.memory_space<vmem>>, vector<8x256xbf16>
    %17 = vector.broadcast %0 : vector<1x256xbf16> to vector<8x256xbf16>
    %18 = arith.mulf %16, %17 : vector<8x256xbf16>
    %c0_18 = arith.constant 0 : index
    %c112 = arith.constant 112 : index
    %19 = vector.load %arg12[%c0_18, %c112] : memref<8x512xbf16, #tpu.memory_space<vmem>>, vector<8x256xbf16>
    %c0_19 = arith.constant 0 : index
    %c113 = arith.constant 113 : index
    %20 = vector.load %arg12[%c0_19, %c113] : memref<8x512xbf16, #tpu.memory_space<vmem>>, vector<8x256xbf16>
    %21 = vector.broadcast %1 : vector<1x256xbf16> to vector<8x256xbf16>
    %22 = arith.mulf %20, %21 : vector<8x256xbf16>
    %c0_20 = arith.constant 0 : index
    %c127 = arith.constant 127 : index
    %23 = vector.load %arg12[%c0_20, %c127] : memref<8x512xbf16, #tpu.memory_space<vmem>>, vector<8x256xbf16>
    %24 = vector.broadcast %0 : vector<1x256xbf16> to vector<8x256xbf16>
    %25 = arith.mulf %23, %24 : vector<8x256xbf16>
    %c0_21 = arith.constant 0 : index
    %c128_22 = arith.constant 128 : index
    %26 = vector.load %arg12[%c0_21, %c128_22] : memref<8x512xbf16, #tpu.memory_space<vmem>>, vector<8x256xbf16>
    %c0_23 = arith.constant 0 : index
    %c129 = arith.constant 129 : index
    %27 = vector.load %arg12[%c0_23, %c129] : memref<8x512xbf16, #tpu.memory_space<vmem>>, vector<8x256xbf16>
    %28 = vector.broadcast %1 : vector<1x256xbf16> to vector<8x256xbf16>
    %29 = arith.mulf %27, %28 : vector<8x256xbf16>
    %c0_24 = arith.constant 0 : index
    %c143 = arith.constant 143 : index
    %30 = vector.load %arg12[%c0_24, %c143] : memref<8x512xbf16, #tpu.memory_space<vmem>>, vector<8x256xbf16>
    %31 = vector.broadcast %0 : vector<1x256xbf16> to vector<8x256xbf16>
    %32 = arith.mulf %30, %31 : vector<8x256xbf16>
    %c0_25 = arith.constant 0 : index
    %c144 = arith.constant 144 : index
    %33 = vector.load %arg12[%c0_25, %c144] : memref<8x512xbf16, #tpu.memory_space<vmem>>, vector<8x256xbf16>
    %c0_26 = arith.constant 0 : index
    %c145 = arith.constant 145 : index
    %34 = vector.load %arg12[%c0_26, %c145] : memref<8x512xbf16, #tpu.memory_space<vmem>>, vector<8x256xbf16>
    %35 = vector.broadcast %1 : vector<1x256xbf16> to vector<8x256xbf16>
    %36 = arith.mulf %34, %35 : vector<8x256xbf16>
    %37 = tpu.concatenate %18, %19, %22, %25, %26, %29, %32, %33, %36 in 0 : vector<8x256xbf16>, vector<8x256xbf16>, vector<8x256xbf16>, vector<8x256xbf16>, vector<8x256xbf16>, vector<8x256xbf16>, vector<8x256xbf16>, vector<8x256xbf16>, vector<8x256xbf16> -> vector<72x256xbf16>
    %c0_27 = arith.constant 0 : index
    %c0_28 = arith.constant 0 : index
    %38 = vector.load %arg5[%c0_27, %c0_28] : memref<8x72xbf16, #tpu.memory_space<vmem>>, vector<8x72xbf16>
    %cst_29 = arith.constant dense<0.000000e+00> : vector<8x256xf32>
    %39 = tpu.matmul %38, %37, %cst_29 {dimension_numbers = #tpu.dot_dimension_numbers<[1], [0], [0], [1], [0, 0, 1, 1], [], []>} : vector<8x72xbf16>, vector<72x256xbf16>, vector<8x256xf32> -> vector<8x256xf32>
    %c0_30 = arith.constant 0 : index
    %c0_31 = arith.constant 0 : index
    %40 = vector.load %arg6[%c0_30, %c0_31] : memref<8x1xf32, #tpu.memory_space<vmem>>, vector<8x1xf32>
    %c0_32 = arith.constant 0 : index
    %c0_33 = arith.constant 0 : index
    %41 = vector.load %arg7[%c0_32, %c0_33] : memref<8x1xf32, #tpu.memory_space<vmem>>, vector<8x1xf32>
    %cst_34 = arith.constant dense<0.000000e+00> : vector<8xf32>
    %42 = vector.multi_reduction <add>, %39, %cst_34 [1] : vector<8x256xf32> to vector<8xf32>
    %43 = vector.shape_cast %42 : vector<8xf32> to vector<8x1xf32>
    %cst_35 = arith.constant 2.560000e+02 : f32
    %44 = vector.broadcast %cst_35 : f32 to vector<8x1xf32>
    %45 = arith.divf %43, %44 : vector<8x1xf32>
    %46 = vector.broadcast %45 : vector<8x1xf32> to vector<8x256xf32>
    %47 = arith.subf %39, %46 : vector<8x256xf32>
    %48 = arith.mulf %47, %47 : vector<8x256xf32>
    %cst_36 = arith.constant dense<0.000000e+00> : vector<8xf32>
    %49 = vector.multi_reduction <add>, %48, %cst_36 [1] : vector<8x256xf32> to vector<8xf32>
    %50 = vector.shape_cast %49 : vector<8xf32> to vector<8x1xf32>
    %cst_37 = arith.constant 2.560000e+02 : f32
    %51 = vector.broadcast %cst_37 : f32 to vector<8x1xf32>
    %52 = arith.divf %50, %51 : vector<8x1xf32>
    %cst_38 = arith.constant 9.99999974E-6 : f32
    %53 = vector.broadcast %cst_38 : f32 to vector<8x1xf32>
    %54 = arith.addf %52, %53 : vector<8x1xf32>
    %55 = math.rsqrt %54 : vector<8x1xf32>
    %56 = vector.broadcast %55 : vector<8x1xf32> to vector<8x256xf32>
    %57 = arith.mulf %47, %56 : vector<8x256xf32>
    %58 = vector.broadcast %40 : vector<8x1xf32> to vector<8x256xf32>
    %59 = arith.mulf %57, %58 : vector<8x256xf32>
    %60 = vector.broadcast %41 : vector<8x1xf32> to vector<8x256xf32>
    %61 = arith.addf %59, %60 : vector<8x256xf32>
    %cst_39 = arith.constant 0.000000e+00 : f32
    %62 = vector.broadcast %cst_39 : f32 to vector<8x256xf32>
    %63 = arith.maximumf %61, %62 : vector<8x256xf32>
    %cst_40 = arith.constant 0.000000e+00 : bf16
    %64 = vector.broadcast %cst_40 : bf16 to vector<8x128xbf16>
    %c0_41 = arith.constant 0 : index
    %c0_42 = arith.constant 0 : index
    %65 = vector.load %arg13[%c0_41, %c0_42] : memref<8x512xbf16, #tpu.memory_space<vmem>>, vector<8x128xbf16>
    tpu.vector_store %arg13[%c0_41, %c0_42], %64 {strides = array<i32>} : memref<8x512xbf16, #tpu.memory_space<vmem>>, vector<8x128xbf16>,
    %cst_43 = arith.constant 0.000000e+00 : bf16
    %66 = vector.broadcast %cst_43 : bf16 to vector<8x128xbf16>
    %c0_44 = arith.constant 0 : index
    %c384_45 = arith.constant 384 : index
    %67 = vector.load %arg13[%c0_44, %c384_45] : memref<8x512xbf16, #tpu.memory_space<vmem>>, vector<8x128xbf16>
    tpu.vector_store %arg13[%c0_44, %c384_45], %66 {strides = array<i32>} : memref<8x512xbf16, #tpu.memory_space<vmem>>, vector<8x128xbf16>,
    %68 = arith.truncf %63 : vector<8x256xf32> to vector<8x256xbf16>
    %c0_46 = arith.constant 0 : index
    %c128_47 = arith.constant 128 : index
    %69 = vector.load %arg13[%c0_46, %c128_47] : memref<8x512xbf16, #tpu.memory_space<vmem>>, vector<8x256xbf16>
    tpu.vector_store %arg13[%c0_46, %c128_47], %68 {strides = array<i32>} : memref<8x512xbf16, #tpu.memory_space<vmem>>, vector<8x256xbf16>,
    %c0_48 = arith.constant 0 : index
    %c111_49 = arith.constant 111 : index
    %70 = vector.load %arg13[%c0_48, %c111_49] : memref<8x512xbf16, #tpu.memory_space<vmem>>, vector<8x256xbf16>
    %71 = vector.broadcast %0 : vector<1x256xbf16> to vector<8x256xbf16>
    %72 = arith.mulf %70, %71 : vector<8x256xbf16>
    %c0_50 = arith.constant 0 : index
    %c112_51 = arith.constant 112 : index
    %73 = vector.load %arg13[%c0_50, %c112_51] : memref<8x512xbf16, #tpu.memory_space<vmem>>, vector<8x256xbf16>
    %c0_52 = arith.constant 0 : index
    %c113_53 = arith.constant 113 : index
    %74 = vector.load %arg13[%c0_52, %c113_53] : memref<8x512xbf16, #tpu.memory_space<vmem>>, vector<8x256xbf16>
    %75 = vector.broadcast %1 : vector<1x256xbf16> to vector<8x256xbf16>
    %76 = arith.mulf %74, %75 : vector<8x256xbf16>
    %c0_54 = arith.constant 0 : index
    %c127_55 = arith.constant 127 : index
    %77 = vector.load %arg13[%c0_54, %c127_55] : memref<8x512xbf16, #tpu.memory_space<vmem>>, vector<8x256xbf16>
    %78 = vector.broadcast %0 : vector<1x256xbf16> to vector<8x256xbf16>
    %79 = arith.mulf %77, %78 : vector<8x256xbf16>
    %c0_56 = arith.constant 0 : index
    %c128_57 = arith.constant 128 : index
    %80 = vector.load %arg13[%c0_56, %c128_57] : memref<8x512xbf16, #tpu.memory_space<vmem>>, vector<8x256xbf16>
    %c0_58 = arith.constant 0 : index
    %c129_59 = arith.constant 129 : index
    %81 = vector.load %arg13[%c0_58, %c129_59] : memref<8x512xbf16, #tpu.memory_space<vmem>>, vector<8x256xbf16>
    %82 = vector.broadcast %1 : vector<1x256xbf16> to vector<8x256xbf16>
    %83 = arith.mulf %81, %82 : vector<8x256xbf16>
    %c0_60 = arith.constant 0 : index
    %c143_61 = arith.constant 143 : index
    %84 = vector.load %arg13[%c0_60, %c143_61] : memref<8x512xbf16, #tpu.memory_space<vmem>>, vector<8x256xbf16>
    %85 = vector.broadcast %0 : vector<1x256xbf16> to vector<8x256xbf16>
    %86 = arith.mulf %84, %85 : vector<8x256xbf16>
    %c0_62 = arith.constant 0 : index
    %c144_63 = arith.constant 144 : index
    %87 = vector.load %arg13[%c0_62, %c144_63] : memref<8x512xbf16, #tpu.memory_space<vmem>>, vector<8x256xbf16>
    %c0_64 = arith.constant 0 : index
    %c145_65 = arith.constant 145 : index
    %88 = vector.load %arg13[%c0_64, %c145_65] : memref<8x512xbf16, #tpu.memory_space<vmem>>, vector<8x256xbf16>
    %89 = vector.broadcast %1 : vector<1x256xbf16> to vector<8x256xbf16>
    %90 = arith.mulf %88, %89 : vector<8x256xbf16>
    %91 = tpu.concatenate %72, %73, %76, %79, %80, %83, %86, %87, %90 in 0 : vector<8x256xbf16>, vector<8x256xbf16>, vector<8x256xbf16>, vector<8x256xbf16>, vector<8x256xbf16>, vector<8x256xbf16>, vector<8x256xbf16>, vector<8x256xbf16>, vector<8x256xbf16> -> vector<72x256xbf16>
    %c0_66 = arith.constant 0 : index
    %c0_67 = arith.constant 0 : index
    %92 = vector.load %arg8[%c0_66, %c0_67] : memref<8x72xbf16, #tpu.memory_space<vmem>>, vector<8x72xbf16>
    %cst_68 = arith.constant dense<0.000000e+00> : vector<8x256xf32>
    %93 = tpu.matmul %92, %91, %cst_68 {dimension_numbers = #tpu.dot_dimension_numbers<[1], [0], [0], [1], [0, 0, 1, 1], [], []>} : vector<8x72xbf16>, vector<72x256xbf16>, vector<8x256xf32> -> vector<8x256xf32>
    %c0_69 = arith.constant 0 : index
    %c0_70 = arith.constant 0 : index
    %94 = vector.load %arg9[%c0_69, %c0_70] : memref<8x1xf32, #tpu.memory_space<vmem>>, vector<8x1xf32>
    %c0_71 = arith.constant 0 : index
    %c0_72 = arith.constant 0 : index
    %95 = vector.load %arg10[%c0_71, %c0_72] : memref<8x1xf32, #tpu.memory_space<vmem>>, vector<8x1xf32>
    %cst_73 = arith.constant dense<0.000000e+00> : vector<8xf32>
    %96 = vector.multi_reduction <add>, %93, %cst_73 [1] : vector<8x256xf32> to vector<8xf32>
    %97 = vector.shape_cast %96 : vector<8xf32> to vector<8x1xf32>
    %cst_74 = arith.constant 2.560000e+02 : f32
    %98 = vector.broadcast %cst_74 : f32 to vector<8x1xf32>
    %99 = arith.divf %97, %98 : vector<8x1xf32>
    %100 = vector.broadcast %99 : vector<8x1xf32> to vector<8x256xf32>
    %101 = arith.subf %93, %100 : vector<8x256xf32>
    %102 = arith.mulf %101, %101 : vector<8x256xf32>
    %cst_75 = arith.constant dense<0.000000e+00> : vector<8xf32>
    %103 = vector.multi_reduction <add>, %102, %cst_75 [1] : vector<8x256xf32> to vector<8xf32>
    %104 = vector.shape_cast %103 : vector<8xf32> to vector<8x1xf32>
    %cst_76 = arith.constant 2.560000e+02 : f32
    %105 = vector.broadcast %cst_76 : f32 to vector<8x1xf32>
    %106 = arith.divf %104, %105 : vector<8x1xf32>
    %cst_77 = arith.constant 9.99999974E-6 : f32
    %107 = vector.broadcast %cst_77 : f32 to vector<8x1xf32>
    %108 = arith.addf %106, %107 : vector<8x1xf32>
    %109 = math.rsqrt %108 : vector<8x1xf32>
    %110 = vector.broadcast %109 : vector<8x1xf32> to vector<8x256xf32>
    %111 = arith.mulf %101, %110 : vector<8x256xf32>
    %112 = vector.broadcast %94 : vector<8x1xf32> to vector<8x256xf32>
    %113 = arith.mulf %111, %112 : vector<8x256xf32>
    %114 = vector.broadcast %95 : vector<8x1xf32> to vector<8x256xf32>
    %115 = arith.addf %113, %114 : vector<8x256xf32>
    %cst_78 = arith.constant 0.000000e+00 : f32
    %116 = vector.broadcast %cst_78 : f32 to vector<8x256xf32>
    %117 = arith.maximumf %115, %116 : vector<8x256xf32>
    %c0_79 = arith.constant 0 : index
    %c0_80 = arith.constant 0 : index
    %c0_81 = arith.constant 0 : index
    %118 = vector.load %arg11[%c0_79, %c0_80, %c0_81] : memref<1x8x256xf32, #tpu.memory_space<vmem>>, vector<1x8x256xf32>
    %119 = vector.shape_cast %118 : vector<1x8x256xf32> to vector<8x256xf32>
    %120 = vector.shape_cast %117 : vector<8x256xf32> to vector<1x8x256xf32>
    tpu.vector_store %arg11[%c0_79, %c0_80, %c0_81], %120 {strides = array<i32>} : memref<1x8x256xf32, #tpu.memory_space<vmem>>, vector<1x8x256xf32>,
    return
  }
  func.func @transform_0(%arg0: i32) -> (i32, i32, i32) {
    %c0_i32 = arith.constant 0 : i32
    %c0_i32_0 = arith.constant 0 : i32
    %c0_i32_1 = arith.constant 0 : i32
    return %arg0, %c0_i32, %c0_i32_0 : i32, i32, i32
  }
  func.func @transform_1(%arg0: i32) -> (i32, i32, i32) {
    %c0_i32 = arith.constant 0 : i32
    %c0_i32_0 = arith.constant 0 : i32
    %c0_i32_1 = arith.constant 0 : i32
    return %arg0, %c0_i32, %c0_i32_0 : i32, i32, i32
  }
  func.func @transform_2(%arg0: i32) -> (i32, i32) {
    %c0_i32 = arith.constant 0 : i32
    %c0_i32_0 = arith.constant 0 : i32
    %c0_i32_1 = arith.constant 0 : i32
    return %c0_i32, %c0_i32_0 : i32, i32
  }
  func.func @transform_3(%arg0: i32) -> (i32, i32) {
    %c0_i32 = arith.constant 0 : i32
    %c0_i32_0 = arith.constant 0 : i32
    %c0_i32_1 = arith.constant 0 : i32
    return %c0_i32, %c0_i32_0 : i32, i32
  }
  func.func @transform_4(%arg0: i32) -> (i32, i32) {
    %c0_i32 = arith.constant 0 : i32
    %c0_i32_0 = arith.constant 0 : i32
    %c0_i32_1 = arith.constant 0 : i32
    return %c0_i32, %c0_i32_0 : i32, i32
  }
  func.func @transform_5(%arg0: i32) -> (i32, i32) {
    %c0_i32 = arith.constant 0 : i32
    %c0_i32_0 = arith.constant 0 : i32
    %c0_i32_1 = arith.constant 0 : i32
    return %c0_i32, %c0_i32_0 : i32, i32
  }
  func.func @transform_6(%arg0: i32) -> (i32, i32) {
    %c0_i32 = arith.constant 0 : i32
    %c0_i32_0 = arith.constant 0 : i32
    %c0_i32_1 = arith.constant 0 : i32
    return %c0_i32, %c0_i32_0 : i32, i32
  }
  func.func @transform_7(%arg0: i32) -> (i32, i32) {
    %c0_i32 = arith.constant 0 : i32
    %c0_i32_0 = arith.constant 0 : i32
    %c0_i32_1 = arith.constant 0 : i32
    return %c0_i32, %c0_i32_0 : i32, i32
  }
  func.func @transform_8(%arg0: i32) -> (i32, i32) {
    %c0_i32 = arith.constant 0 : i32
    %c0_i32_0 = arith.constant 0 : i32
    %c0_i32_1 = arith.constant 0 : i32
    return %c0_i32, %c0_i32_0 : i32, i32
  }
  func.func @transform_9(%arg0: i32) -> (i32, i32) {
    %c0_i32 = arith.constant 0 : i32
    %c0_i32_0 = arith.constant 0 : i32
    %c0_i32_1 = arith.constant 0 : i32
    return %c0_i32, %c0_i32_0 : i32, i32
  }
  func.func @transform_10(%arg0: i32) -> (i32, i32, i32) {
    %c0_i32 = arith.constant 0 : i32
    %c0_i32_0 = arith.constant 0 : i32
    %c0_i32_1 = arith.constant 0 : i32
    return %arg0, %c0_i32, %c0_i32_0 : i32, i32, i32
  }
}

</mosaic_0001>

<bundles_post_ra>
// kernel: up_forward.1
= control target key start
LH: loop header
LB: loop body
LE: loop exit
PB: predicated region body
PF: predicated region fallthrough
CT: control target
= control target key end

     0   :  { %s1540_s13 = smov 0   ;;  %s1894_s0 = inlined_call_operand.vmem [shape: bf16[2,4,256], index: 0, kind: input, shape index: {}]   ;;  %s1895_s1 = inlined_call_operand.vmem [shape: bf16[2,4,64], index: 1, kind: input, shape index: {}]   ;;  %s1896_s2 = inlined_call_operand.vmem [shape: f32[64,256], index: 2, kind: input, shape index: {}]   ;;  %s1897_s3 = inlined_call_operand.vmem [shape: bf16[2,256], index: 3, kind: input, shape index: {}]   ;;  %s1898_s4 = inlined_call_operand.vmem [shape: bf16[8,72], index: 4, kind: input, shape index: {}]   ;;  %s1899_s5 = inlined_call_operand.vmem [shape: f32[8,1], index: 5, kind: input, shape index: {}]   ;;  %s1900_s6 = inlined_call_operand.vmem [shape: f32[8,1], index: 6, kind: input, shape index: {}]   ;;  %s1901_s7 = inlined_call_operand.vmem [shape: bf16[8,72], index: 7, kind: input, shape index: {}]   ;;  %s1902_s8 = inlined_call_operand.vmem [shape: f32[8,1], index: 8, kind: input, shape index: {}]   ;;  %s1903_s9 = inlined_call_operand.vmem [shape: f32[8,1], index: 9, kind: input, shape index: {}]   ;;  %s1904_s10 = inlined_call_operand.vmem [shape: f32[2,8,256], index: 10, kind: output, shape index: {}]  }
   0x1 LB: > { %s1343_s14 = sadd.s32 4294967295, %s1468_s13   ;;  %p1347_p0 = scmp.ge.s32.totalorder %s1468_s13, 1  ;;  %s1468_s13 = sphi %s1540_s13, %s20_s13  }
   0x2   : > { %p321_p1 = scmp.lt.s32.totalorder %s1468_s13, 3 }
   0x4   : > { %p322_p2 = pnand %p1347_p0, %p321_p1 }
   0x5   : > { %p363_p3 = scmp.lt.s32.totalorder (!%p322_p2), %s1343_s14, 1  ;;  %s1473_s21 = smov (!%p322_p2), 17  }
   0x6   : > { %325 = sbr.rel (%p322_p2) target bundleno = 1809 (0x711), region = 60  ;;  %s1474_s22 = smov (!%p322_p2), 1  }
   0x7   : > { %s1475_s23 = smov (!%p322_p2), 15   ;;  %s1476_s24 = smov (!%p322_p2), 113  }
   0x8   : > { %s1477_s25 = smov (!%p322_p2), 95   ;;  %s1479_s27 = smov (!%p322_p2), 111  }
   0x9   : > { %s1480_s28 = smov (!%p322_p2), 94   ;;  %s1482_s11 = smov (!%p322_p2), 110  }
   0xa   : > { %s1483_s12 = smov (!%p322_p2), 126   ;;  %s1484_s15 = smov (!%p322_p2), 112  }
   0xb   : > { %v396_v0 = vld [vmem:[%s1896_s2 + $0x78] sm:$0xff]  ;;  %v395_v1 = vld [vmem:[%s1896_s2 + $0x70] sm:$0xff]  ;;  %v394_v2 = vld [vmem:[%s1896_s2 + $0x68] sm:$0xff]  ;;  %v509_v3 = vlaneseq  ;;  %v1470_v5 = vmov 0.0   ;;  %s1906_s14 = smov (!%p363_p3, %s1343_s14), 1  ;;  %v1472_v11 = vmov 0  }
   0xc   : > { %417 = vmatprep.subr.mxu0 %v396_v0  ;;  %v393_v4 = vld [vmem:[%s1896_s2 + $0x60] sm:$0xff]  ;;  %465 = vmatprep.mubr.f32.mxu0 %v1470_v5  ;;  %v392_v6 = vld [vmem:[%s1896_s2 + $0x58] sm:$0xff]  ;;  %v1471_v7 = vmov 1966171168   ;;  %v391_v10 = vld [vmem:[%s1896_s2 + $0x50] sm:$0xff]  ;;  %s1418_s29 = sshll.u32 %s1906_s14, 2 }
   0xd   : > { %418 = vmatpush1.msra.mxu0 %v395_v1  ;;  %v507_v8 = vunpack.c.l.s4 %v1471_v7  ;;  %v510_v9 = vshrl.u32 %v509_v3, 7  ;;  %473 = vst [vmem:[#allocation2 + $0xc] sm:$0xf] %v1472_v11  ;;  %472 = vst [vmem:[#allocation2] sm:$0xf] %v1472_v11  ;;  %891 = vmatprep.mubr.bf16.mxu1 %v1472_v11  ;;  %v390_v12 = vld [vmem:[%s1896_s2 + $0x48] sm:$0xff]  ;;  %s367_s17 = scalar_lea.vmem %s1894_s0, %s1418_s29 }
   0xe   : > { %419 = vmatprep.subr.mxu0 %v394_v2  ;;  %935 = vst [vmem:[#allocation3] sm:$0xf] %v1472_v11  ;;  %936 = vst [vmem:[#allocation3 + $0xc] sm:$0xf] %v1472_v11  ;;  %s1350_s30 = sshll.u32 %s1906_s14, 1  ;;  %1446 = vset.pattern.permute.xlu1 %v1472_v11  ;;  %v389_v14 = vld [vmem:[%s1896_s2 + $0x40] sm:$0xff] }
   0xf   : > { %420 = vmatpush1.msra.mxu0 %v393_v4  ;;  %v508_v13 = vunpack.c.0.s8 %v507_v8  ;;  %v1356_v15 = vld.sshfl [vmem:[%s1897_s3] sm:$0x11 pattern:$0x75316420]  ;;  %1445 = vset.pattern.permute.xlu0 %v1472_v11  ;;  %v388_v16 = vld [vmem:[%s1896_s2 + $0x38] sm:$0xff]  ;;  %v387_v20 = vld [vmem:[%s1896_s2 + $0x30] sm:$0xff]  ;;  %s371_s26 = scalar_lea.vmem %s1895_s1, %s1350_s30 }
  0x10   : > { %421 = vmatprep.subr.mxu0 %v392_v6  ;;  %v1354_v17 = vld.sshfl [vmem:[%s367_s17] sm:$0x33 pattern:$0x76325410]  ;;  %v505_v18 = vcombine.high %v1356_v15, %v1356_v15  ;;  %v386_v21 = vld [vmem:[%s1896_s2 + $0x28] sm:$0xff]  ;;  %v525_v25 = vsub.s32 0, %v510_v9 }
  0x11   : > { %422 = vmatpush1.msra.mxu0 %v391_v10  ;;  %v511_v19 = vsub.s32 %v508_v13, %v510_v9  ;;  %484 = vst [vmem:[#allocation2 + $0x4] sm:$0x33] %v1354_v17  ;;  %v385_v24 = vld [vmem:[%s1896_s2 + $0x20] sm:$0xff]  ;;  %v384_v26 = vld [vmem:[%s1896_s2 + $0x18] sm:$0xff]  ;;  %v383_v32 = vld [vmem:[%s1896_s2 + $0x10] sm:$0xff]  ;;  %vm397_vm0 = vcmask 523264  }
  0x12   : > { %423 = vmatprep.subr.mxu0 %v390_v12  ;;  %v379_v27 = vld [vmem:[%s371_s26] sm:$0x3]  ;;  %v382_v33 = vld [vmem:[%s1896_s2 + $0x8] sm:$0xff]  ;;  %s1478_s26 = smov 127   ;;  %vm609_vm1 = vcmask 138240   ;;  %vm591_vm2 = vcmask 7168  }
  0x13   : > { %424 = vmatpush1.msra.mxu0 %v389_v14  ;;  %v512_v22 = vrot.slane %v1356_v15, %v511_v19  ;;  %v519_v23 = vrot.slane %v505_v18, %v511_v19  ;;  %v381_v36 = vld [vmem:[%s1896_s2] sm:$0xff]  ;;  %v380_v37 = vunpack.c.l.bf16 %v379_v27  ;;  %vm600_vm3 = vcmask 121856   ;;  %s1481_s29 = smov 96  }
  0x14   : > { %425 = vmatprep.subr.mxu0 %v388_v16  ;;  %v587_v44 = vld [vmem:[#allocation2 + $0xc] sm:$0xf]  ;;  %vm570_vm4 = vcmask 924672   ;;  %vm579_vm5 = vcmask 1039360   ;;  %vm748_vm6 = vcmask 769024   ;;  %vm751_vm7 = vcmask 1043456  }
  0x15   : > { %426 = vmatpush1.msra.mxu0 %v387_v20  ;;  %v548_v28 = vshrl.u32 %v512_v22, 16  ;;  %v555_v29 = vshrl.u32 %v519_v23, 16  ;;  %v521_v30 = vpack.i.b16 %v512_v22, %v512_v22  ;;  %v528_v31 = vpack.i.b16 %v519_v23, %v519_v23 }
  0x16   : > { %427 = vmatprep.subr.mxu0 %v386_v21  ;;  %v1381_v45 = vcombine.low %v587_v44, %v587_v44  ;;  %vm731_vm8 = vcmask 777216   ;;  %vm714_vm9 = vcmask 785408   ;;  %vm697_vm10 = vcmask 900096  }
  0x17   : > { %428 = vmatpush1.msra.mxu0 %v385_v24  ;;  %v549_v34 = vpack.i.b16 %v548_v28, %v548_v28  ;;  %v556_v35 = vpack.i.b16 %v555_v29, %v555_v29  ;;  %v526_v40 = vrot.slane %v521_v30, %v525_v25  ;;  %v533_v41 = vrot.slane %v528_v31, %v525_v25 }
  0x18   : > { %429 = vmatprep.subr.mxu0 %v384_v26  ;;  %vm542_vm11 = vcmask 908288   ;;  %vm653_vm12 = vcmask 1031168   ;;  %vm670_vm13 = vcmask 916480   ;;  %vm849_vm14 = vcmask 588800  }
  0x19   : > { %430 = vmatpush1.msra.mxu0 %v383_v32  ;;  %v554_v38 = vrot.slane %v549_v34, %v525_v25  ;;  %v561_v39 = vrot.slane %v556_v35, %v525_v25  ;;  %v1357_v43 = vcombine.low %v526_v40, %v533_v41 }
  0x1a   : > { %431 = vmatprep.subr.mxu0 %v382_v33 }
  0x1b   : > { %432 = vmatpush1.msra.mxu0 %v381_v36  ;;  %v1358_v42 = vcombine.low %v554_v38, %v561_v39 }
  0x1c   : > { %1353 = vmatmul.mubr.msk.f32.vlgmr.msra.gmra.mxu0 %vm397_vm0, %v380_v37 }
  0x1d   : > { %606 = vrot.lane.b32.xlu0 %v1358_v42, %s1473_s21  ;;  %588 = vrot.lane.b32.xlu1 %v1358_v42, %s1474_s22 }
  0x1e   : > { %1231 = vmatprep.mubr.bf16.mxu0 %v1472_v11 }
  0x21   : > { %597 = vrot.lane.b32.xlu0 %v1357_v43, %s1475_s23  ;;  %567 = vrot.lane.b32.xlu1 %v1358_v42, %s1476_s24 }
  0x25   : > { %729 = vrot.lane.b32.xlu1 %v1381_v45, %s1477_s25  ;;  %576 = vrot.lane.b32.xlu0 %v1357_v43, %s1478_s26 }
  0x29   : > { %539 = vrot.lane.b32.xlu1 %v1357_v43, %s1479_s27 }
  0x8f   : > { %v607_v46 = vpop.permute.xlu0 %606  ;;  %v589_v47 = vpop.permute.xlu1 %588 }
  0x90   : > { %v1621_v48 = vrot.slane %v607_v46, 4  ;;  %v1623_v49 = vrot.slane %v589_v47, 4 }
  0x92   : > { %v1627_v50 = vsel %vm609_vm1, %v1621_v48, %v607_v46  ;;  %v1630_v51 = vsel %vm591_vm2, %v1623_v49, %v589_v47  ;;  %v614_v52 = vmul.bf16 %v1621_v48, %v587_v44  ;;  %v596_v58 = vmul.bf16 %v1623_v49, %v587_v44 }
  0x93   : > { %v598_v53 = vpop.permute.xlu0 %597  ;;  %v568_v9 = vpop.permute.xlu1 %567 }
  0x94   : > { %v1633_v54 = vrot.slane %v598_v53, 4  ;;  %v1384_v55 = vcombine.low %v614_v52, %v614_v52  ;;  %v1375_v60 = vcombine.low %v596_v58, %v596_v58  ;;  %v1655_v10 = vrot.slane %v568_v9, 4 }
  0x96   : > { %v1636_v56 = vsel %vm600_vm3, %v1633_v54, %v598_v53  ;;  %746 = vrot.lane.b32.xlu1 %v1384_v55, %s1480_s28  ;;  %v605_v57 = vmul.bf16 %v1633_v54, %v587_v44  ;;  %v1667_v20 = vsel %vm570_vm4, %v1655_v10, %v568_v9 }
  0x97   : > { %v577_v15 = vpop.permute.xlu0 %576  ;;  %v730_v34 = vpop.permute.xlu1 %729 }
  0x98   : > { %v1378_v59 = vcombine.low %v605_v57, %v605_v57  ;;  %v1662_v16 = vrot.slane %v577_v15, 4 }
  0x9a   : > { %712 = vrot.lane.b32.xlu0 %v1378_v59, %s1481_s29  ;;  %v1677_v25 = vsel %vm579_vm5, %v1662_v16, %v577_v15 }
  0x9b   : > { %v540_v36 = vpop.permute.xlu1 %539 }
  0x9e   : > { %695 = vrot.lane.b32.xlu0 %v1375_v60, %s1482_s11 }
  0xdc   : > { %v467_v61 = vpop.f32.mrf.mxu0 }
  0xde   : > { %v469_v62 = vpop.f32.mrf.mxu0 }
  0xdf   : > { %v1420_v63 = vpack.c.bf16 %v469_v62, %v467_v61 }
  0xe1   : > { %v492_v0 = vrot.slane %v1420_v63, 6 }
  0xe3   : > { %494 = vst [vmem:[#allocation2 + $0x4] sm:$0xcc] %v492_v0 }
  0xea   : > { %v586_v1 = vld [vmem:[#allocation2 + $0x4] sm:$0xff] }
  0xeb   : > { %v1380_v2 = vcombine.high %v586_v1, %v586_v1  ;;  %v1379_v3 = vcombine.low %v586_v1, %v586_v1  ;;  %v613_v4 = vmul.bf16 %v1627_v50, %v586_v1  ;;  %v1646_v5 = vld [vmem:[#allocation2] sm:$0xff]  ;;  %v604_v8 = vmul.bf16 %v1636_v56, %v586_v1  ;;  %v1658_v14 = vld [vmem:[#allocation2 + $0x8] sm:$0xf] }
  0xec   : > { %v1363_v7 = vcombine.high %v1646_v5, %v1646_v5  ;;  %v595_v13 = vmul.bf16 %v1630_v51, %v586_v1  ;;  %v575_v19 = vmul.bf16 %v1655_v10, %v1658_v14  ;;  %v574_v21 = vmul.bf16 %v1667_v20, %v1646_v5 }
  0xed   : > { %727 = vrot.lane.b32.xlu0 %v1380_v2, %s1477_s25  ;;  %725 = vrot.lane.b32.xlu1 %v1379_v3, %s1477_s25  ;;  %v1382_v6 = vcombine.low %v613_v4, %v613_v4  ;;  %v1377_v11 = vcombine.high %v604_v8, %v604_v8  ;;  %v1383_v12 = vcombine.high %v613_v4, %v613_v4 }
  0xee   : > { %v1374_v17 = vcombine.high %v595_v13, %v595_v13  ;;  %v1376_v18 = vcombine.low %v604_v8, %v604_v8  ;;  %v1367_v22 = vcombine.low %v575_v19, %v575_v19  ;;  %v1373_v23 = vcombine.low %v595_v13, %v595_v13 }
  0xef   : > { %v584_v24 = vmul.bf16 %v1662_v16, %v1658_v14  ;;  %v583_v26 = vmul.bf16 %v1677_v25, %v1646_v5  ;;  %v1366_v28 = vcombine.high %v574_v21, %v574_v21  ;;  %v1364_v31 = vcombine.low %v1658_v14, %v1658_v14 }
  0xf0   : > { %v1365_v32 = vcombine.low %v574_v21, %v574_v21  ;;  %v1362_v33 = vcombine.low %v1646_v5, %v1646_v5 }
  0xf1   : > { %680 = vrot.lane.b32.xlu1 %v1380_v2, %s1479_s27  ;;  %678 = vrot.lane.b32.xlu0 %v1379_v3, %s1479_s27  ;;  %v1370_v27 = vcombine.low %v584_v24, %v584_v24  ;;  %v1368_v29 = vcombine.low %v583_v26, %v583_v26  ;;  %v1369_v30 = vcombine.high %v583_v26, %v583_v26  ;;  %v1711_v2 = vrot.slane %v540_v36, 4 }
  0xf5   : > { %742 = vrot.lane.b32.xlu1 %v1382_v6, %s1480_s28  ;;  %633 = vrot.lane.b32.xlu0 %v1363_v7, %s1478_s26 }
  0xf9   : > { %710 = vrot.lane.b32.xlu1 %v1377_v11, %s1481_s29  ;;  %744 = vrot.lane.b32.xlu0 %v1383_v12, %s1480_s28  ;;  %v1721_v11 = vsel %vm542_vm11, %v1711_v2, %v540_v36 }
  0xfd   : > { %693 = vrot.lane.b32.xlu1 %v1374_v17, %s1482_s11  ;;  %708 = vrot.lane.b32.xlu0 %v1376_v18, %s1481_s29 }
 0x101   : > { %651 = vrot.lane.b32.xlu1 %v1367_v22, %s1483_s12  ;;  %691 = vrot.lane.b32.xlu0 %v1373_v23, %s1482_s11  ;;  %v546_v22 = vmul.bf16 %v1721_v11, %v1646_v5  ;;  %v547_v23 = vmul.bf16 %v1711_v2, %v1658_v14 }
 0x103   : > { %v1361_v14 = vcombine.low %v547_v23, %v547_v23  ;;  %v1359_v36 = vcombine.low %v546_v22, %v546_v22 }
 0x105   : > { %668 = vrot.lane.b32.xlu1 %v1370_v27, %s1484_s15  ;;  %649 = vrot.lane.b32.xlu0 %v1366_v28, %s1483_s12 }
 0x108   : > { %v747_v38 = vpop.permute.xlu1 %746 }
 0x109   : > { %664 = vrot.lane.b32.xlu1 %v1368_v29, %s1484_s15  ;;  %666 = vrot.lane.b32.xlu0 %v1369_v30, %s1484_s15 }
 0x10c   : > { %v713_v35 = vpop.permute.xlu0 %712 }
 0x10d   : > { %635 = vrot.lane.b32.xlu1 %v1364_v31, %s1478_s26  ;;  %647 = vrot.lane.b32.xlu0 %v1365_v32, %s1483_s12  ;;  %v1360_v31 = vcombine.high %v546_v22, %v546_v22 }
 0x110   : > { %v696_v37 = vpop.permute.xlu0 %695 }
 0x111   : > { %631 = vrot.lane.b32.xlu0 %v1362_v33, %s1478_s26 }
 0x15f   : > { %v728_v39 = vpop.permute.xlu0 %727  ;;  %v726_v40 = vpop.permute.xlu1 %725 }
 0x160   : > { %v732_v59 = vsel %vm731_vm8, %v726_v40, %v728_v39  ;;  %v733_v3 = vsel %vm731_vm8, %v728_v39, %v730_v34 }
 0x163   : > { %v681_v41 = vpop.permute.xlu1 %680  ;;  %v679_v42 = vpop.permute.xlu0 %678 }
 0x164   : > { %v682_v12 = vsel %vm542_vm11, %v679_v42, %v681_v41 }
 0x167   : > { %v743_v43 = vpop.permute.xlu1 %742  ;;  %v1694_v44 = vpop.permute.xlu0 %633 }
 0x168   : > { %825 = vrot.lane.b32.xlu1 %v743_v43, %s1473_s21 }
 0x16b   : > { %v711_v45 = vpop.permute.xlu1 %710  ;;  %v745_v46 = vpop.permute.xlu0 %744 }
 0x16c   : > { %v750_v47 = vsel %vm748_vm6, %v745_v46, %v747_v38  ;;  %v749_v52 = vsel %vm748_vm6, %v743_v43, %v745_v46  ;;  %v716_v0 = vsel %vm714_vm9, %v711_v45, %v713_v35 }
 0x16d   : > { %829 = vrot.lane.b32.xlu1 %v750_v47, %s1473_s21  ;;  %827 = vrot.lane.b32.xlu0 %v749_v52, %s1473_s21  ;;  %v787_v7 = vsel %vm751_vm7, %v716_v0, %v733_v3 }
 0x16f   : > { %v694_v53 = vpop.permute.xlu1 %693  ;;  %v709_v55 = vpop.permute.xlu0 %708 }
 0x170   : > { %v781_v57 = vsel %vm751_vm7, %v709_v55, %v726_v40  ;;  %v715_v58 = vsel %vm714_vm9, %v709_v55, %v711_v45  ;;  %v699_v1 = vsel %vm697_vm10, %v694_v53, %v696_v37 }
 0x171   : > { %819 = vrot.lane.b32.xlu0 %v781_v57, %s1473_s21  ;;  %v784_v63 = vsel %vm751_vm7, %v715_v58, %v732_v59  ;;  %v778_v8 = vsel %vm751_vm7, %v681_v41, %v699_v1 }
 0x173   : > { %v652_v60 = vpop.permute.xlu1 %651  ;;  %v692_v61 = vpop.permute.xlu0 %691 }
 0x174   : > { %v772_v62 = vsel %vm751_vm7, %v679_v42, %v692_v61  ;;  %v698_v9 = vsel %vm697_vm10, %v692_v61, %v694_v53 }
 0x175   : > { %813 = vrot.lane.b32.xlu1 %v772_v62, %s1473_s21  ;;  %821 = vrot.lane.b32.xlu0 %v784_v63, %s1473_s21  ;;  %v775_v19 = vsel %vm751_vm7, %v682_v12, %v698_v9 }
 0x177   : > { %v669_v4 = vpop.permute.xlu1 %668  ;;  %v650_v6 = vpop.permute.xlu0 %649 }
 0x178   : > { %v655_v17 = vsel %vm653_vm12, %v650_v6, %v652_v60  ;;  %v769_v29 = vsel %vm751_vm7, %v652_v60, %v669_v4 }
 0x179   : > { %823 = vrot.lane.b32.xlu1 %v787_v7, %s1473_s21  ;;  %817 = vrot.lane.b32.xlu0 %v778_v8, %s1473_s21  ;;  %v788_v8 = vld [vmem:[%s1898_s4] sm:$0xf] }
 0x17b   : > { %v665_v13 = vpop.permute.xlu1 %664  ;;  %v667_v15 = vpop.permute.xlu0 %666 }
 0x17c   : > { %v672_v18 = vsel %vm670_vm13, %v667_v15, %v669_v4  ;;  %v671_v27 = vsel %vm670_vm13, %v665_v13, %v667_v15 }
 0x17d   : > { %815 = vrot.lane.b32.xlu1 %v775_v19, %s1473_s21  ;;  %v766_v21 = vsel %vm751_vm7, %v655_v17, %v672_v18  ;;  %v900_v18 = vld [vmem:[%s1899_s5] sm:$0xff] }
 0x17e   : > { %809 = vrot.lane.b32.xlu0 %v766_v21, %s1473_s21 }
 0x17f   : > { %v636_v24 = vpop.permute.xlu1 %635  ;;  %v648_v26 = vpop.permute.xlu0 %647 }
 0x180   : > { %v654_v28 = vsel %vm653_vm12, %v648_v26, %v650_v6  ;;  %v638_v30 = vsel %vm579_vm5, %v1694_v44, %v636_v24  ;;  %v760_v35 = vsel %vm751_vm7, %v1361_v14, %v636_v24 }
 0x181   : > { %811 = vrot.lane.b32.xlu1 %v769_v29, %s1473_s21  ;;  %v763_v5 = vsel %vm751_vm7, %v654_v28, %v671_v27  ;;  %v757_v33 = vsel %vm751_vm7, %v1360_v31, %v638_v30  ;;  %v956_v28 = vld [vmem:[#allocation3 + $0xc] sm:$0xf]  ;;  %v901_v29 = vld [vmem:[%s1900_s6] sm:$0xff] }
 0x182   : > { %807 = vrot.lane.b32.xlu0 %v763_v5, %s1473_s21  ;;  %v962_v30 = vmul.bf16 %v956_v28, %v1621_v48  ;;  %v960_v31 = vmul.bf16 %v956_v28, %v1633_v54  ;;  %v958_v14 = vmul.bf16 %v956_v28, %v1623_v49 }
 0x183   : > { %v632_v32 = vpop.permute.xlu0 %631 }
 0x184   : > { %v637_v34 = vsel %vm579_vm5, %v632_v32, %v1694_v44  ;;  %v1413_v5 = vcombine.low %v962_v30, %v962_v30  ;;  %v1407_v32 = vcombine.low %v960_v31, %v960_v31 }
 0x185   : > { %803 = vrot.lane.b32.xlu1 %v757_v33, %s1473_s21  ;;  %v754_v37 = vsel %vm751_vm7, %v1359_v36, %v637_v34  ;;  %v1404_v33 = vcombine.low %v958_v14, %v958_v14  ;;  %v1410_v34 = vcombine.low %v956_v28, %v956_v28 }
 0x186   : > { %805 = vrot.lane.b32.xlu0 %v760_v35, %s1473_s21 }
 0x189   : > { %801 = vrot.lane.b32.xlu1 %v754_v37, %s1473_s21 }
 0x1da   : > { %v826_v38 = vpop.permute.xlu1 %825 }
 0x1df   : > { %v830_v39 = vpop.permute.xlu1 %829  ;;  %v828_v40 = vpop.permute.xlu0 %827 }
 0x1e0   : > { %v840_v41 = vsel %vm609_vm1, %v828_v40, %v830_v39  ;;  %v839_v42 = vsel %vm609_vm1, %v826_v38, %v828_v40 }
 0x1e1   : > { %1385 = vmatprep.subr.msk.bf16.mxu1 %vm751_vm7, %v840_v41  ;;  %v854_v43 = vsel %vm751_vm7, %v839_v42, 0 }
 0x1e2   : > { %866 = vmatpush1.bf16.msra.mxu1 %v854_v43 }
 0x1e3   : > { %v820_v44 = vpop.permute.xlu0 %819 }
 0x1e7   : > { %v814_v45 = vpop.permute.xlu1 %813  ;;  %v822_v46 = vpop.permute.xlu0 %821 }
 0x1e8   : > { %v837_v55 = vsel %vm609_vm1, %v820_v44, %v822_v46 }
 0x1eb   : > { %v824_v47 = vpop.permute.xlu1 %823  ;;  %v818_v52 = vpop.permute.xlu0 %817 }
 0x1ec   : > { %v838_v53 = vsel %vm609_vm1, %v822_v46, %v824_v47 }
 0x1ed   : > { %867 = vmatprep.subr.bf16.mxu1 %v838_v53 }
 0x1ee   : > { %868 = vmatpush1.bf16.msra.mxu1 %v837_v55 }
 0x1ef   : > { %v816_v57 = vpop.permute.xlu1 %815 }
 0x1f0   : > { %v810_v58 = vpop.permute.xlu0 %809  ;;  %v836_v59 = vsel %vm609_vm1, %v816_v57, %v818_v52  ;;  %v835_v60 = vsel %vm609_vm1, %v814_v45, %v816_v57 }
 0x1f1   : > { %869 = vmatprep.subr.bf16.mxu1 %v836_v59 }
 0x1f2   : > { %870 = vmatpush1.bf16.msra.mxu1 %v835_v60 }
 0x1f3   : > { %v812_v61 = vpop.permute.xlu1 %811 }
 0x1f4   : > { %v808_v62 = vpop.permute.xlu0 %807  ;;  %v834_v63 = vsel %vm609_vm1, %v810_v58, %v812_v61 }
 0x1f5   : > { %871 = vmatprep.subr.bf16.mxu1 %v834_v63  ;;  %v833_v0 = vsel %vm609_vm1, %v808_v62, %v810_v58 }
 0x1f6   : > { %872 = vmatpush1.bf16.msra.mxu1 %v833_v0 }
 0x1f7   : > { %v804_v1 = vpop.permute.xlu1 %803 }
 0x1f8   : > { %v806_v3 = vpop.permute.xlu0 %805 }
 0x1f9   : > { %v832_v4 = vsel %vm609_vm1, %v804_v1, %v806_v3 }
 0x1fa   : > { %873 = vmatprep.subr.bf16.mxu1 %v832_v4 }
 0x1fb   : > { %v802_v6 = vpop.permute.xlu1 %801 }
 0x1fc   : > { %v831_v7 = vsel %vm609_vm1, %v802_v6, %v804_v1 }
 0x1fd   : > { %874 = vmatpush1.bf16.msra.mxu1 %v831_v7 }
 0x200   : > { %1386 = vmatmul.mubr.msk.bf16.vlgmr.msra.gmra.mxu1 %vm849_vm14, %v788_v8 }
 0x2c0   : > { %v893_v9 = vpop.f32.mrf.mxu1 }
 0x2c2   : > { %v895_v12 = vpop.f32.mrf.mxu1 }
 0x2c3   : > { %v902_v13 = vadd.f32 %v895_v12, %v893_v9 }
 0x2c4   : > { %v897_v15 = vpop.f32.mrf.mxu1 }
 0x2c5   : > { %903 = vadd.xlane.f32.xlu0 %v902_v13 }
 0x2c6   : > { %v898_v17 = vpop.f32.mrf.mxu1 }
 0x2db   : > { %921 = vperm.xlu0 %1445, %v900_v18  }
 0x2df   : > { %1073 = vrot.lane.b32.xlu0 %v1410_v34, %s1477_s25 }
 0x34e   : > { %v904_v19 = vpop.xlane.xlu0 %903 }
 0x34f   : > { %v906_v21 = vmul.f32 0.00390625, %v904_v19 }
 0x351   : > { %v907_v22 = vsub.f32 %v893_v9, %v906_v21  ;;  %v908_v23 = vsub.f32 %v895_v12, %v906_v21 }
 0x353   : > { %v909_v24 = vmul.f32 %v907_v22, %v907_v22  ;;  %v910_v26 = vmul.f32 %v908_v23, %v908_v23 }
 0x355   : > { %v911_v27 = vadd.f32 %v910_v26, %v909_v24 }
 0x356   : > { %v922_v38 = vpop.permute.xlu0 %921 }
 0x357   : > { %912 = vadd.xlane.f32.xlu1 %v911_v27 }
 0x35a   : > { %v1074_v17 = vpop.permute.xlu0 %1073 }
 0x368   : > { %928 = vperm.xlu1 %1446, %v901_v29  }
 0x36c   : > { %1089 = vrot.lane.b32.xlu1 %v1413_v5, %s1480_s28 }
 0x370   : > { %1057 = vrot.lane.b32.xlu1 %v1407_v32, %s1481_s29 }
 0x374   : > { %1041 = vrot.lane.b32.xlu1 %v1404_v33, %s1482_s11 }
 0x3e0   : > { %v913_v35 = vpop.xlane.xlu1 %912 }
 0x3e1   : > { %v914_v36 = vmul.f32 0.00390625, %v913_v35 }
 0x3e3   : > { %v915_v48 = vadd.f32 1e-05, %v914_v36 }
 0x3e4   : > { %v929_v42 = vpop.permute.xlu1 %928 }
 0x3e5   : > { %1456 = vrsqrt.f32 %v915_v48 }
 0x3e8   : > { %v1090_v13 = vpop.permute.xlu1 %1089 }
 0x3ec   : > { %v1058_v15 = vpop.permute.xlu1 %1057 }
 0x3f0   : > { %v1042_v18 = vpop.permute.xlu1 %1041 }
 0x3f2   : > { %v1457_v37 = vpop.eup %1456 }
 0x3f3   : > { %v917_v54 = vmul.f32 %v1457_v37, %v907_v22  ;;  %v918_v39 = vmul.f32 %v1457_v37, %v908_v23 }
 0x3f5   : > { %v924_v40 = vmul.f32 %v922_v38, %v917_v54  ;;  %v925_v41 = vmul.f32 %v922_v38, %v918_v39 }
 0x3f7   : > { %v931_v49 = vadd.f32 %v929_v42, %v924_v40  ;;  %v932_v43 = vadd.f32 %v929_v42, %v925_v41 }
 0x3f9   : > { %v933_v44 = vmax.f32 %v931_v49, 0.0  ;;  %v934_v45 = vmax.f32 %v932_v43, 0.0 }
 0x3fb   : > { %v1421_v46 = vpack.c.bf16 %v934_v45, %v933_v44  ;;  %v1460_v47 = vpack.c.bf16 %v934_v45, %v934_v45  ;;  %v1461_v52 = vpack.c.bf16 %v933_v44, %v933_v44 }
 0x3fd   : > { %945 = vst [vmem:[#allocation3 + $0x4] sm:$0xff] %v1421_v46  ;;  %1071 = vrot.lane.b32.xlu1 %v1460_v47, %s1477_s25  ;;  %1069 = vrot.lane.b32.xlu0 %v1461_v52, %s1477_s25  ;;  %v961_v53 = vmul.bf16 %v1421_v46, %v1627_v50  ;;  %v957_v59 = vmul.bf16 %v1421_v46, %v1630_v51 }
 0x3fe   : > { %v959_v50 = vmul.bf16 %v1421_v46, %v1636_v56 }
 0x3ff   : > { %v1411_v57 = vcombine.low %v961_v53, %v961_v53  ;;  %v1412_v60 = vcombine.high %v961_v53, %v961_v53  ;;  %v1403_v61 = vcombine.high %v957_v59, %v957_v59  ;;  %v1402_v56 = vcombine.low %v957_v59, %v957_v59 }
 0x400   : > { %v1405_v63 = vcombine.low %v959_v50, %v959_v50  ;;  %v1406_v1 = vcombine.high %v959_v50, %v959_v50 }
 0x401   : > { %1026 = vrot.lane.b32.xlu0 %v1460_v47, %s1479_s27  ;;  %1024 = vrot.lane.b32.xlu1 %v1461_v52, %s1479_s27  ;;  %s1419_s27 = sshll.u32 %s1906_s14, 4 }
 0x404   : > { %v1784_v55 = vld [vmem:[#allocation3] sm:$0xff]  ;;  %v1800_v4 = vld [vmem:[#allocation3 + $0x8] sm:$0xf] }
 0x405   : > { %v1392_v58 = vcombine.high %v1784_v55, %v1784_v55  ;;  %1085 = vrot.lane.b32.xlu1 %v1411_v57, %s1480_s28  ;;  %v950_v62 = vmul.bf16 %v1784_v55, %v1667_v20  ;;  %v952_v51 = vmul.bf16 %v1784_v55, %v1677_v25  ;;  %v951_v6 = vmul.bf16 %v1800_v4, %v1655_v10 }
 0x406   : > { %v1391_v7 = vcombine.low %v1784_v55, %v1784_v55  ;;  %v953_v8 = vmul.bf16 %v1800_v4, %v1662_v16  ;;  %v1393_v10 = vcombine.low %v1800_v4, %v1800_v4  ;;  %v949_v53 = vmul.bf16 %v1800_v4, %v1711_v2 }
 0x407   : > { %981 = vrot.lane.b32.xlu0 %v1392_v58, %s1478_s26  ;;  %v1395_v0 = vcombine.high %v950_v62, %v950_v62  ;;  %v1398_v3 = vcombine.high %v952_v51, %v952_v51  ;;  %v1394_v20 = vcombine.low %v950_v62, %v950_v62  ;;  %v1396_v25 = vcombine.low %v951_v6, %v951_v6 }
 0x408   : > { %v1399_v9 = vcombine.low %v953_v8, %v953_v8  ;;  %v1397_v12 = vcombine.low %v952_v51, %v952_v51  ;;  %v948_v58 = vmul.bf16 %v1784_v55, %v1721_v11  ;;  %v1390_v62 = vcombine.low %v949_v53, %v949_v53 }
 0x409   : > { %1087 = vrot.lane.b32.xlu1 %v1412_v60, %s1480_s28 }
 0x40a   : > { %v1389_v2 = vcombine.high %v948_v58, %v948_v58 }
 0x40b   : > { %1039 = vrot.lane.b32.xlu0 %v1403_v61, %s1482_s11 }
 0x40d   : > { %1053 = vrot.lane.b32.xlu1 %v1405_v63, %s1481_s29 }
 0x40f   : > { %997 = vrot.lane.b32.xlu0 %v1395_v0, %s1483_s12 }
 0x411   : > { %1055 = vrot.lane.b32.xlu1 %v1406_v1, %s1481_s29 }
 0x413   : > { %1013 = vrot.lane.b32.xlu0 %v1398_v3, %s1484_s15  ;;  %v1388_v3 = vcombine.low %v948_v58, %v948_v58 }
 0x415   : > { %1037 = vrot.lane.b32.xlu1 %v1402_v56, %s1482_s11  ;;  %s376_s11 = scalar_lea.vmem %s1904_s10, %s1419_s27 }
 0x417   : > { %995 = vrot.lane.b32.xlu0 %v1394_v20, %s1483_s12 }
 0x419   : > { %999 = vrot.lane.b32.xlu1 %v1396_v25, %s1483_s12 }
 0x41b   : > { %979 = vrot.lane.b32.xlu0 %v1391_v7, %s1478_s26 }
 0x41d   : > { %1015 = vrot.lane.b32.xlu1 %v1399_v9, %s1484_s15 }
 0x421   : > { %1011 = vrot.lane.b32.xlu1 %v1397_v12, %s1484_s15 }
 0x425   : > { %983 = vrot.lane.b32.xlu1 %v1393_v10, %s1478_s26 }
 0x46f   : > { %v1072_v16 = vpop.permute.xlu1 %1071  ;;  %v1070_v19 = vpop.permute.xlu0 %1069 }
 0x470   : > { %v1075_v32 = vsel %vm731_vm8, %v1070_v19, %v1072_v16  ;;  %v1076_v54 = vsel %vm731_vm8, %v1072_v16, %v1074_v17 }
 0x473   : > { %v1025_v21 = vpop.permute.xlu1 %1024  ;;  %v1027_v22 = vpop.permute.xlu0 %1026 }
 0x474   : > { %v1028_v49 = vsel %vm542_vm11, %v1025_v21, %v1027_v22 }
 0x477   : > { %v1086_v23 = vpop.permute.xlu1 %1085 }
 0x478   : > { %1166 = vrot.lane.b32.xlu1 %v1086_v23, %s1473_s21 }
 0x479   : > { %v982_v24 = vpop.permute.xlu0 %981 }
 0x47b   : > { %v1088_v26 = vpop.permute.xlu1 %1087 }
 0x47c   : > { %v1092_v27 = vsel %vm748_vm6, %v1088_v26, %v1090_v13  ;;  %v1091_v28 = vsel %vm748_vm6, %v1086_v23, %v1088_v26 }
 0x47d   : > { %1170 = vrot.lane.b32.xlu1 %v1092_v27, %s1473_s21  ;;  %1168 = vrot.lane.b32.xlu0 %v1091_v28, %s1473_s21  ;;  %v1040_v29 = vpop.permute.xlu0 %1039 }
 0x47e   : > { %v1044_v35 = vsel %vm697_vm10, %v1040_v29, %v1042_v18 }
 0x47f   : > { %v1054_v30 = vpop.permute.xlu1 %1053  ;;  %v1119_v38 = vsel %vm751_vm7, %v1027_v22, %v1044_v35 }
 0x480   : > { %v1122_v5 = vsel %vm751_vm7, %v1054_v30, %v1070_v19 }
 0x481   : > { %1160 = vrot.lane.b32.xlu0 %v1122_v5, %s1473_s21  ;;  %v998_v33 = vpop.permute.xlu0 %997 }
 0x483   : > { %v1056_v31 = vpop.permute.xlu1 %1055 }
 0x484   : > { %v1059_v14 = vsel %vm714_vm9, %v1054_v30, %v1056_v31  ;;  %v1060_v37 = vsel %vm714_vm9, %v1056_v31, %v1058_v15 }
 0x485   : > { %v1125_v34 = vsel %vm751_vm7, %v1059_v14, %v1075_v32  ;;  %v1014_v39 = vpop.permute.xlu0 %1013  ;;  %v1128_v41 = vsel %vm751_vm7, %v1060_v37, %v1076_v54  ;;  %v1129_v32 = vld [vmem:[%s1901_s7] sm:$0xf] }
 0x486   : > { %1162 = vrot.lane.b32.xlu0 %v1125_v34, %s1473_s21 }
 0x487   : > { %v1038_v36 = vpop.permute.xlu1 %1037 }
 0x488   : > { %v1113_v48 = vsel %vm751_vm7, %v1025_v21, %v1038_v36  ;;  %v1043_v42 = vsel %vm697_vm10, %v1038_v36, %v1040_v29 }
 0x489   : > { %1154 = vrot.lane.b32.xlu1 %v1113_v48, %s1473_s21  ;;  %v1116_v46 = vsel %vm751_vm7, %v1028_v49, %v1043_v42  ;;  %v996_v47 = vpop.permute.xlu0 %995  ;;  %v1240_v48 = vld [vmem:[%s1902_s8] sm:$0xff] }
 0x48a   : > { %1158 = vrot.lane.b32.xlu0 %v1119_v38, %s1473_s21  ;;  %v1001_v59 = vsel %vm653_vm12, %v996_v47, %v998_v33  ;;  %v1241_v49 = vld [vmem:[%s1903_s9] sm:$0xff] }
 0x48b   : > { %v1000_v40 = vpop.permute.xlu1 %999 }
 0x48c   : > { %v1002_v44 = vsel %vm653_vm12, %v998_v33, %v1000_v40 }
 0x48d   : > { %1164 = vrot.lane.b32.xlu1 %v1128_v41, %s1473_s21  ;;  %v980_v63 = vpop.permute.xlu0 %979 }
 0x48e   : > { %v985_v1 = vsel %vm579_vm5, %v980_v63, %v982_v24 }
 0x48f   : > { %v1016_v43 = vpop.permute.xlu1 %1015  ;;  %v1095_v4 = vsel %vm751_vm7, %v1388_v3, %v985_v1 }
 0x490   : > { %v1018_v45 = vsel %vm670_vm13, %v1014_v39, %v1016_v43  ;;  %v1110_v61 = vsel %vm751_vm7, %v1000_v40, %v1016_v43 }
 0x491   : > { %1156 = vrot.lane.b32.xlu1 %v1116_v46, %s1473_s21  ;;  %v1107_v52 = vsel %vm751_vm7, %v1002_v44, %v1018_v45 }
 0x492   : > { %1150 = vrot.lane.b32.xlu0 %v1107_v52, %s1473_s21 }
 0x493   : > { %v1012_v57 = vpop.permute.xlu1 %1011 }
 0x494   : > { %v1017_v60 = vsel %vm670_vm13, %v1012_v57, %v1014_v39 }
 0x495   : > { %1152 = vrot.lane.b32.xlu1 %v1110_v61, %s1473_s21  ;;  %v1104_v50 = vsel %vm751_vm7, %v1001_v59, %v1017_v60 }
 0x496   : > { %1148 = vrot.lane.b32.xlu0 %v1104_v50, %s1473_s21 }
 0x497   : > { %v984_v0 = vpop.permute.xlu1 %983 }
 0x498   : > { %v986_v51 = vsel %vm579_vm5, %v982_v24, %v984_v0  ;;  %v1101_v11 = vsel %vm751_vm7, %v1390_v62, %v984_v0 }
 0x499   : > { %v1098_v55 = vsel %vm751_vm7, %v1389_v2, %v986_v51 }
 0x49a   : > { %1144 = vrot.lane.b32.xlu1 %v1098_v55, %s1473_s21  ;;  %1146 = vrot.lane.b32.xlu0 %v1101_v11, %s1473_s21 }
 0x49e   : > { %1142 = vrot.lane.b32.xlu1 %v1095_v4, %s1473_s21 }
 0x4ea   : > { %v1167_v56 = vpop.permute.xlu1 %1166 }
 0x4ef   : > { %v1171_v20 = vpop.permute.xlu1 %1170  ;;  %v1169_v6 = vpop.permute.xlu0 %1168 }
 0x4f0   : > { %v1180_v25 = vsel %vm609_vm1, %v1167_v56, %v1169_v6  ;;  %v1181_v7 = vsel %vm609_vm1, %v1169_v6, %v1171_v20 }
 0x4f1   : > { %v1194_v8 = vsel %vm751_vm7, %v1180_v25, 0  ;;  %1414 = vmatprep.subr.msk.bf16.mxu0 %vm751_vm7, %v1181_v7 }
 0x4f2   : > { %1206 = vmatpush1.bf16.msra.mxu0 %v1194_v8 }
 0x4f3   : > { %v1161_v9 = vpop.permute.xlu0 %1160 }
 0x4f8   : > { %v1163_v12 = vpop.permute.xlu0 %1162 }
 0x4f9   : > { %v1178_v18 = vsel %vm609_vm1, %v1161_v9, %v1163_v12 }
 0x4fb   : > { %v1155_v10 = vpop.permute.xlu1 %1154 }
 0x4fc   : > { %v1159_v15 = vpop.permute.xlu0 %1158 }
 0x4ff   : > { %v1165_v13 = vpop.permute.xlu1 %1164 }
 0x500   : > { %v1179_v17 = vsel %vm609_vm1, %v1163_v12, %v1165_v13 }
 0x501   : > { %1207 = vmatprep.subr.bf16.mxu0 %v1179_v17 }
 0x502   : > { %1208 = vmatpush1.bf16.msra.mxu0 %v1178_v18 }
 0x503   : > { %v1157_v16 = vpop.permute.xlu1 %1156 }
 0x504   : > { %v1176_v19 = vsel %vm609_vm1, %v1155_v10, %v1157_v16  ;;  %v1151_v21 = vpop.permute.xlu0 %1150  ;;  %v1177_v22 = vsel %vm609_vm1, %v1157_v16, %v1159_v15 }
 0x505   : > { %1209 = vmatprep.subr.bf16.mxu0 %v1177_v22 }
 0x506   : > { %1210 = vmatpush1.bf16.msra.mxu0 %v1176_v19 }
 0x507   : > { %v1153_v23 = vpop.permute.xlu1 %1152 }
 0x508   : > { %v1149_v24 = vpop.permute.xlu0 %1148  ;;  %v1175_v26 = vsel %vm609_vm1, %v1151_v21, %v1153_v23 }
 0x509   : > { %v1174_v27 = vsel %vm609_vm1, %v1149_v24, %v1151_v21  ;;  %1211 = vmatprep.subr.bf16.mxu0 %v1175_v26 }
 0x50a   : > { %1212 = vmatpush1.bf16.msra.mxu0 %v1174_v27 }
 0x50c   : > { %v1145_v28 = vpop.permute.xlu1 %1144  ;;  %v1147_v29 = vpop.permute.xlu0 %1146 }
 0x50d   : > { %v1173_v30 = vsel %vm609_vm1, %v1145_v28, %v1147_v29 }
 0x50e   : > { %1213 = vmatprep.subr.bf16.mxu0 %v1173_v30 }
 0x510   : > { %v1143_v5 = vpop.permute.xlu1 %1142 }
 0x511   : > { %v1172_v31 = vsel %vm609_vm1, %v1143_v5, %v1145_v28 }
 0x512   : > { %1214 = vmatpush1.bf16.msra.mxu0 %v1172_v31 }
 0x515   : > { %1415 = vmatmul.mubr.msk.bf16.vlgmr.msra.gmra.mxu0 %vm849_vm14, %v1129_v32 }
 0x5d5   : > { %v1233_v14 = vpop.f32.mrf.mxu0 }
 0x5d7   : > { %v1235_v33 = vpop.f32.mrf.mxu0 }
 0x5d8   : > { %v1242_v34 = vadd.f32 %v1235_v33, %v1233_v14 }
 0x5d9   : > { %v1237_v35 = vpop.f32.mrf.mxu0 }
 0x5da   : > { %1243 = vadd.xlane.f32.xlu0 %v1242_v34 }
 0x5db   : > { %v1238_v36 = vpop.f32.mrf.mxu0 }
 0x5f0   : > { %1260 = vperm.xlu0 %1445, %v1240_v48  }
 0x663   : > { %v1244_v37 = vpop.xlane.xlu0 %1243 }
 0x664   : > { %v1245_v38 = vmul.f32 0.00390625, %v1244_v37 }
 0x666   : > { %v1246_v54 = vsub.f32 %v1233_v14, %v1245_v38  ;;  %v1247_v39 = vsub.f32 %v1235_v33, %v1245_v38 }
 0x668   : > { %v1248_v40 = vmul.f32 %v1246_v54, %v1246_v54  ;;  %v1249_v41 = vmul.f32 %v1247_v39, %v1247_v39 }
 0x66a   : > { %v1250_v42 = vadd.f32 %v1249_v41, %v1248_v40 }
 0x66b   : > { %v1261_v53 = vpop.permute.xlu0 %1260 }
 0x66c   : > { %1251 = vadd.xlane.f32.xlu1 %v1250_v42 }
 0x67d   : > { %1267 = vperm.xlu1 %1446, %v1241_v49  }
 0x6f5   : > { %v1252_v43 = vpop.xlane.xlu1 %1251 }
 0x6f6   : > { %v1253_v44 = vmul.f32 0.00390625, %v1252_v43 }
 0x6f8   : > { %v1254_v45 = vadd.f32 1e-05, %v1253_v44 }
 0x6f9   : > { %v1268_v59 = vpop.permute.xlu1 %1267 }
 0x6fa   : > { %1458 = vrsqrt.f32 %v1254_v45 }
 0x707   : > { %v1459_v46 = vpop.eup %1458 }
 0x708   : > { %v1256_v47 = vmul.f32 %v1459_v46, %v1246_v54  ;;  %v1257_v52 = vmul.f32 %v1459_v46, %v1247_v39 }
 0x70a   : > { %v1263_v57 = vmul.f32 %v1261_v53, %v1256_v47  ;;  %v1264_v58 = vmul.f32 %v1261_v53, %v1257_v52 }
 0x70c   : > { %v1270_v60 = vadd.f32 %v1268_v59, %v1263_v57  ;;  %v1271_v61 = vadd.f32 %v1268_v59, %v1264_v58 }
 0x70e   : > { %v1272_v50 = vmax.f32 %v1270_v60, 0.0  ;;  %v1273_v62 = vmax.f32 %v1271_v61, 0.0 }
 0x710   : > { %1274 = vst [vmem:[%s376_s11] sm:$0xff] %v1272_v50  ;;  %1275 = vst [vmem:[%s376_s11 + $0x8] sm:$0xff] %v1273_v62 }
 0x711 PF: > { %s20_s13 = sadd.s32 1, %s1468_s13  }
 0x712   : > { %p17_p4 = scmp.ge.s32.totalorder %s20_s13, 4  }
 0x714   :  { %19 = sbr.rel (!%p17_p4) target bundleno = 1 (0x1), region = 93 }

</bundles_post_ra>
